<compile_context>
chip_gen: v5e
topology: v5e:2x2
jax: 0.10.0
libtpu: 0.0.40
codegen_flags: <defaults>
</compile_context>

<pallas_src>
import functools

import jax
import jax.numpy as jnp
from jax.experimental import pallas as pl
from jax.experimental.pallas import tpu as pltpu


_LANE = 128          # vreg lane width
_SUBLANE = 8         # vreg sublane count (f32)
_MAX_TL = 2048       # cap on lanes per block (roofline already ~flat at 1024)
_MAX_BN = 32         # cap on batch rows per block (in-kernel static unroll)
_TARGET_X_BYTES = 512 * 1024   # aim for ~0.5 MiB of input per grid step


def _round_up(x, m):
    return ((x + m - 1) // m) * m


def _round_down(x, m):
    return (x // m) * m


def _vmem_capacity_bytes():
    """Physical VMEM of the current TPU generation (conservative fallback)."""
    try:
        return int(pltpu.get_tpu_info().vmem_capacity_bytes)
    except Exception:
        return 64 << 20   # v7x has the smallest VMEM (64 MiB) -> safe everywhere


def _plan_tiles(N, Cin, Cout_p, L, xsz, osz, wsz):
    """Choose (BN, TK, TL, vmem_limit_bytes) from the VMEM budget and shapes."""
    cap = _vmem_capacity_bytes()
    # Keep the pipelined block buffers well inside scoped VMEM on every generation
    # (v5e/v6e: 128 MiB physical, v7x: 64 MiB).
    budget = min(cap // 2, 28 << 20)

    def step_bytes(bn, tk, tl):
        return (2 * bn * tk * tl * xsz            # x blocks (double-buffered)
                + 2 * Cout_p * tk * wsz           # w blocks
                + 2 * bn * Cout_p * tl * osz      # out blocks
                + bn * Cout_p * tl * 4            # f32 accumulator scratch
                + 2 * Cout_p * 4)                 # bias blocks

    # --- K (Cin) tile: keep the whole reduction in one block unless the weight/x
    #     blocks alone would blow the budget (multi-thousand Cin).
    if step_bytes(1, Cin, min(L, _LANE)) <= budget:
        TK = Cin
    else:
        denom = 2 * _LANE * xsz + 2 * Cout_p * wsz
        TK = max(_LANE, _round_down(budget // max(1, denom), _LANE))
        if TK >= Cin:
            TK = Cin

    # --- L (lane) tile: the largest 128-multiple that fits; ragged tails are masked
    #     (never fall back to a small exact divisor of L).
    fixed = 2 * Cout_p * (TK * wsz + 4)
    denom = 2 * TK * xsz + 2 * Cout_p * osz + Cout_p * 4
    tl = _round_down(max(0, budget - fixed) // max(1, denom), _LANE)
    tl = max(_LANE, min(tl, _MAX_TL))
    TL = L if L <= tl else tl

    # --- Batch rows per block: raise DMA granularity when Cin*TL is small.
    bn = max(1, _TARGET_X_BYTES // max(1, TK * TL * xsz))
    bn = min(bn, N, _MAX_BN)
    while bn > 1 and step_bytes(bn, TK, TL) > budget:
        bn -= 1
    BN = max(1, bn)

    # v7x has 2 TensorCores: keep at least two parallel grid steps when possible.
    if BN > 1 and pl.cdiv(N, BN) == 1 and pl.cdiv(L, TL) == 1:
        BN = max(1, (N + 1) // 2)

    vmem_limit = int(min(cap // 2,
                         max(16 << 20, step_bytes(BN, TK, TL) + (8 << 20))))
    return BN, TK, TL, vmem_limit


def _feature_conv_kernel(x_ref, w_ref, b_ref, o_ref, acc_ref, *, cin, tk):
    # x_ref: (BN, TK, TL)  w_ref: (Cout_p, TK)  b_ref: (Cout_p, 1)
    # o_ref: (BN, Cout_p, TL)  acc_ref: (BN, Cout_p, TL) f32
    k = pl.program_id(2)

    @pl.when(k == 0)
    def _init():
        acc_ref[...] = jnp.zeros_like(acc_ref)

    x = x_ref[...]
    if cin % tk != 0:
        # Ragged last K tile: zero the garbage channel rows so they contribute
        # exactly 0 (weights beyond Cin are zero-padded in the wrapper).
        row = jax.lax.broadcasted_iota(jnp.int32, x.shape, 1)
        x = jnp.where(k * tk + row < cin, x, 0)

    w = w_ref[...]
    for b in range(x.shape[0]):                     # static unroll over batch rows
        acc_ref[b] += jnp.dot(w, x[b], preferred_element_type=jnp.float32)

    @pl.when(k == pl.num_programs(2) - 1)
    def _finalize():
        y = acc_ref[...] + b_ref[...][None]         # bias, broadcast over (BN, TL)
        o_ref[...] = jnp.maximum(y, 0.0).astype(o_ref.dtype)


def _fold_bn(gamma, beta, mean, var, eps=1e-5):
    """Return (scale, shift) such that BN(x) = x*scale + shift (eval mode)."""
    inv_std = 1.0 / jnp.sqrt(var + eps)
    scale = gamma * inv_std
    shift = beta - mean * scale
    return scale, shift


def feature_conv(x_ncw, w, gamma1, beta1, mean1, var1,
                 gamma2, beta2, mean2, var2, eps=1e-5):
    """Eval-mode FeatureConv forward.

    x_ncw: (N, Cin, L)
    w:     (Cout, Cin)  (PyTorch Conv1d weight squeezed over the kernel dim)
    Returns (N, Cout, L) in x's dtype.
    """
    N, Cin, L = x_ncw.shape
    Cout = w.shape[0]
    dtype = x_ncw.dtype

    s1, t1 = _fold_bn(gamma1, beta1, mean1, var1, eps)   # (Cin,)
    s2, t2 = _fold_bn(gamma2, beta2, mean2, var2, eps)   # (Cout,)

    # Fold BN1 + 1x1 conv + BN2 into one affine map (exact for k=1, bias-free conv).
    w32 = w.astype(jnp.float32)
    w_eff = (s2[:, None] * w32) * s1[None, :]            # (Cout, Cin)
    b_eff = s2 * (w32 @ t1) + t2                         # (Cout,)

    # Pad Cout to a sublane multiple so output stores are unmasked.
    Cout_p = _round_up(Cout, _SUBLANE)

    xsz = jnp.dtype(dtype).itemsize
    BN, TK, TL, vmem_limit = _plan_tiles(N, Cin, Cout_p, L, xsz, xsz, xsz)

    nk = pl.cdiv(Cin, TK)
    Cin_p = nk * TK   # zero-pad weight columns so a ragged last K tile contributes 0

    w_pad = jnp.zeros((Cout_p, Cin_p), jnp.float32).at[:Cout, :Cin].set(w_eff)
    w_pad = w_pad.astype(dtype)                          # matmul operand dtype = x dtype
    b_pad = jnp.zeros((Cout_p, 1), jnp.float32).at[:Cout, 0].set(b_eff)

    grid = (pl.cdiv(N, BN), pl.cdiv(L, TL), nk)
    kernel = functools.partial(_feature_conv_kernel, cin=Cin, tk=TK)

    out = pl.pallas_call(
        kernel,
        out_shape=jax.ShapeDtypeStruct((N, Cout_p, L), dtype),
        grid_spec=pltpu.PrefetchScalarGridSpec(
            num_scalar_prefetch=0,
            grid=grid,
            in_specs=[
                pl.BlockSpec((BN, TK, TL), lambda n, l, k: (n, k, l)),   # x
                pl.BlockSpec((Cout_p, TK), lambda n, l, k: (0, k)),      # W_eff
                pl.BlockSpec((Cout_p, 1), lambda n, l, k: (0, 0)),       # b_eff
            ],
            out_specs=pl.BlockSpec((BN, Cout_p, TL), lambda n, l, k: (n, 0, l)),
            scratch_shapes=[pltpu.VMEM((BN, Cout_p, TL), jnp.float32)],
        ),
        compiler_params=pltpu.CompilerParams(
            dimension_semantics=("parallel", "parallel", "arbitrary"),
            vmem_limit_bytes=vmem_limit),
    )(x_ncw, w_pad, b_pad)

    if Cout_p != Cout:
        out = out[:, :Cout, :]
    return out


if __name__ == "__main__":
    def run_case(key, N, Cin, Cout, L):
        keys = jax.random.split(key, 10)
        x = jax.random.normal(keys[0], (N, Cin, L), dtype=jnp.float32)
        # Conv1d weight: PyTorch shape (Cout, Cin, 1) -> squeeze the kernel dim.
        w = jax.random.normal(keys[1], (Cout, Cin), dtype=jnp.float32) * 0.1

        gamma1 = 1.0 + 0.1 * jax.random.normal(keys[2], (Cin,), dtype=jnp.float32)
        beta1 = 0.1 * jax.random.normal(keys[3], (Cin,), dtype=jnp.float32)
        mean1 = 0.1 * jax.random.normal(keys[4], (Cin,), dtype=jnp.float32)
        var1 = jnp.abs(jax.random.normal(keys[5], (Cin,), dtype=jnp.float32)) + 0.5

        gamma2 = 1.0 + 0.1 * jax.random.normal(keys[6], (Cout,), dtype=jnp.float32)
        beta2 = 0.1 * jax.random.normal(keys[7], (Cout,), dtype=jnp.float32)
        mean2 = 0.1 * jax.random.normal(keys[8], (Cout,), dtype=jnp.float32)
        var2 = jnp.abs(jax.random.normal(keys[9], (Cout,), dtype=jnp.float32)) + 0.5

        out = feature_conv(x, w, gamma1, beta1, mean1, var1,
                           gamma2, beta2, mean2, var2)
        out = jax.block_until_ready(out)
        assert out.shape == (N, Cout, L)

        # Pure-JAX reference (same math as PyTorch eval-mode forward, unfused).
        s1, t1 = _fold_bn(gamma1, beta1, mean1, var1)
        s2, t2 = _fold_bn(gamma2, beta2, mean2, var2)
        xn = x * s1[None, :, None] + t1[None, :, None]          # BN1
        y = jnp.einsum("oc,ncl->nol", w, xn)                    # Conv1d k=1
        y = y * s2[None, :, None] + t2[None, :, None]           # BN2
        ref = jnp.maximum(y, 0.0)                               # ReLU

        assert jnp.allclose(out, ref, atol=1e-5, rtol=1e-5), \
            f"mismatch vs reference for {(N, Cin, L)} -> {(N, Cout, L)}"

    key = jax.random.PRNGKey(0)
    k1, k2 = jax.random.split(key)
    # Nominal small shapes implied by the module.
    run_case(k1, N=2, Cin=4, Cout=32, L=16)
    # Exercises Cout sublane padding (20 -> 24) and a ragged/masked L tail (2176 -> 2048 + 128).
    run_case(k2, N=3, Cin=4, Cout=20, L=2176)
    print("KERNEL_OK")
</pallas_src>

<mosaic_0001>
module attributes {stable_mosaic.version = 11 : i64} {
  func.func @_feature_conv_kernel(%arg0: i32, %arg1: i32, %arg2: i32, %arg3: memref<1x4x16xf32, #tpu.memory_space<vmem>>, %arg4: memref<32x4xf32, #tpu.memory_space<vmem>>, %arg5: memref<32x1xf32, #tpu.memory_space<vmem>>, %arg6: memref<1x32x16xf32, #tpu.memory_space<vmem>>, %arg7: memref<1x32x16xf32, #tpu.memory_space<vmem>>) attributes {dimension_semantics = [#tpu.dimension_semantics<parallel>, #tpu.dimension_semantics<parallel>, #tpu.dimension_semantics<arbitrary>], iteration_bounds = array<i64: 2, 1, 1>, scalar_prefetch = 0 : i64, scratch_operands = 1 : i64, tpu.core_type = #tpu.core_type<tc>, window_params = [{transform_indices = @transform_0, window_bounds = array<i64: 1, 4, 16>}, {transform_indices = @transform_1, window_bounds = array<i64: 32, 4>}, {pipeline_mode = #tpu.pipeline_mode<synchronous>, transform_indices = @transform_2, window_bounds = array<i64: 32, 1>}, {transform_indices = @transform_3, window_bounds = array<i64: 1, 32, 16>}]} {
    %c0_i32 = arith.constant 0 : i32
    %0 = arith.cmpi eq, %arg2, %c0_i32 : i32
    %1 = arith.extui %0 : i1 to i32
    %c0_i32_0 = arith.constant 0 : i32
    %2 = arith.cmpi ne, %1, %c0_i32_0 : i32
    scf.if %2 {
      %cst_13 = arith.constant 0.000000e+00 : f32
      %16 = vector.broadcast %cst_13 : f32 to vector<1x32x16xf32>
      %c0_14 = arith.constant 0 : index
      %c0_15 = arith.constant 0 : index
      %c0_16 = arith.constant 0 : index
      %17 = vector.load %arg7[%c0_14, %c0_15, %c0_16] : memref<1x32x16xf32, #tpu.memory_space<vmem>>, vector<1x32x16xf32>
      tpu.vector_store %arg7[%c0_14, %c0_15, %c0_16], %16 {strides = array<i32>} : memref<1x32x16xf32, #tpu.memory_space<vmem>>, vector<1x32x16xf32>,
    } else {
    }
    %c0 = arith.constant 0 : index
    %c0_1 = arith.constant 0 : index
    %c0_2 = arith.constant 0 : index
    %3 = vector.load %arg3[%c0, %c0_1, %c0_2] : memref<1x4x16xf32, #tpu.memory_space<vmem>>, vector<1x4x16xf32>
    %c0_3 = arith.constant 0 : index
    %c0_4 = arith.constant 0 : index
    %4 = vector.load %arg4[%c0_3, %c0_4] : memref<32x4xf32, #tpu.memory_space<vmem>>, vector<32x4xf32>
    %c0_5 = arith.constant 0 : index
    %c0_6 = arith.constant 0 : index
    %c0_7 = arith.constant 0 : index
    %5 = vector.load %arg7[%c0_5, %c0_6, %c0_7] : memref<1x32x16xf32, #tpu.memory_space<vmem>>, vector<1x32x16xf32>
    %6 = vector.shape_cast %5 : vector<1x32x16xf32> to vector<32x16xf32>
    %7 = vector.shape_cast %3 : vector<1x4x16xf32> to vector<4x16xf32>
    %cst = arith.constant dense<0.000000e+00> : vector<32x16xf32>
    %8 = tpu.matmul %4, %7, %cst {dimension_numbers = #tpu.dot_dimension_numbers<[1], [0], [0], [1], [0, 0, 1, 1], [], []>} : vector<32x4xf32>, vector<4x16xf32>, vector<32x16xf32> -> vector<32x16xf32>
    %9 = arith.addf %6, %8 : vector<32x16xf32>
    %c0_8 = arith.constant 0 : index
    %c0_9 = arith.constant 0 : index
    %c0_10 = arith.constant 0 : index
    %10 = vector.load %arg7[%c0_8, %c0_9, %c0_10] : memref<1x32x16xf32, #tpu.memory_space<vmem>>, vector<1x32x16xf32>
    %11 = vector.shape_cast %10 : vector<1x32x16xf32> to vector<32x16xf32>
    %12 = vector.shape_cast %9 : vector<32x16xf32> to vector<1x32x16xf32>
    tpu.vector_store %arg7[%c0_8, %c0_9, %c0_10], %12 {strides = array<i32>} : memref<1x32x16xf32, #tpu.memory_space<vmem>>, vector<1x32x16xf32>,
    %c0_i32_11 = arith.constant 0 : i32
    %13 = arith.cmpi eq, %arg2, %c0_i32_11 : i32
    %14 = arith.extui %13 : i1 to i32
    %c0_i32_12 = arith.constant 0 : i32
    %15 = arith.cmpi ne, %14, %c0_i32_12 : i32
    scf.if %15 {
      %c0_13 = arith.constant 0 : index
      %c0_14 = arith.constant 0 : index
      %c0_15 = arith.constant 0 : index
      %16 = vector.load %arg7[%c0_13, %c0_14, %c0_15] : memref<1x32x16xf32, #tpu.memory_space<vmem>>, vector<1x32x16xf32>
      %c0_16 = arith.constant 0 : index
      %c0_17 = arith.constant 0 : index
      %17 = vector.load %arg5[%c0_16, %c0_17] : memref<32x1xf32, #tpu.memory_space<vmem>>, vector<32x1xf32>
      %18 = vector.shape_cast %17 : vector<32x1xf32> to vector<1x32x1xf32>
      %19 = vector.broadcast %18 : vector<1x32x1xf32> to vector<1x32x16xf32>
      %20 = arith.addf %16, %19 : vector<1x32x16xf32>
      %cst_18 = arith.constant 0.000000e+00 : f32
      %21 = vector.broadcast %cst_18 : f32 to vector<1x32x16xf32>
      %22 = arith.maximumf %20, %21 : vector<1x32x16xf32>
      %c0_19 = arith.constant 0 : index
      %c0_20 = arith.constant 0 : index
      %c0_21 = arith.constant 0 : index
      %23 = vector.load %arg6[%c0_19, %c0_20, %c0_21] : memref<1x32x16xf32, #tpu.memory_space<vmem>>, vector<1x32x16xf32>
      tpu.vector_store %arg6[%c0_19, %c0_20, %c0_21], %22 {strides = array<i32>} : memref<1x32x16xf32, #tpu.memory_space<vmem>>, vector<1x32x16xf32>,
    } else {
    }
    return
  }
  func.func @transform_0(%arg0: i32, %arg1: i32, %arg2: i32) -> (i32, i32, i32) {
    %c0_i32 = arith.constant 0 : i32
    return %arg0, %arg2, %arg1 : i32, i32, i32
  }
  func.func @transform_1(%arg0: i32, %arg1: i32, %arg2: i32) -> (i32, i32) {
    %c0_i32 = arith.constant 0 : i32
    %c0_i32_0 = arith.constant 0 : i32
    return %c0_i32, %arg2 : i32, i32
  }
  func.func @transform_2(%arg0: i32, %arg1: i32, %arg2: i32) -> (i32, i32) {
    %c0_i32 = arith.constant 0 : i32
    %c0_i32_0 = arith.constant 0 : i32
    %c0_i32_1 = arith.constant 0 : i32
    return %c0_i32, %c0_i32_0 : i32, i32
  }
  func.func @transform_3(%arg0: i32, %arg1: i32, %arg2: i32) -> (i32, i32, i32) {
    %c0_i32 = arith.constant 0 : i32
    %c0_i32_0 = arith.constant 0 : i32
    return %arg0, %c0_i32, %arg1 : i32, i32, i32
  }
}

</mosaic_0001>

<bundles_post_ra>
// kernel: tpu_custom_call.1
= control target key start
LH: loop header
LB: loop body
LE: loop exit
PB: predicated region body
PF: predicated region fallthrough
CT: control target
= control target key end

     0   :  { %s546_s12 = smov 0   ;;  %s548_s13 = smov 0   ;;  %s619_s0 = inlined_call_operand.vmem [shape: f32[2,4,16], index: 0, kind: input, shape index: {}]   ;;  %s620_s1 = inlined_call_operand.vmem [shape: f32[32,4], index: 1, kind: input, shape index: {}]   ;;  %s621_s2 = inlined_call_operand.vmem [shape: f32[32,1], index: 2, kind: input, shape index: {}]   ;;  %s622_s3 = inlined_call_operand.vmem [shape: f32[2,32,16], index: 3, kind: output, shape index: {}]  }
   0x1   :  { %s550_s14 = smov 0  }
   0x2 LB: > { %s32_s15 = sadd.s32 1, %s518_s13  ;;  %p457_p0 = scmp.ge.s32.totalorder %s522_s14, 1  ;;  %s522_s14 = sphi %s550_s14, %s13_s14   ;;  %s518_s13 = sphi %s548_s13, %s624_s13   ;;  %s514_s12 = sphi %s546_s12, %s623_s12  }
   0x3   : > { %p34_p1 = scmp.ge.s32.totalorder %s32_s15, 2  ;;  %p176_p2 = scmp.lt.s32.totalorder %s522_s14, 3 }
   0x5   : > { %s626_s15 = smov (%p34_p1, %s32_s15), 0  ;;  %p177_p3 = pnand %p457_p0, %p176_p2 }
   0x6   : > { %p212_p4 = scmp.lt.s32.totalorder (!%p177_p3), %s514_s12, 1 }
   0x7   : > { %180 = sbr.rel (%p177_p3) target bundleno = 167 (0xa7), region = 32 }
   0xc   : > { %v316_v0 = vld [vmem:[%s621_s2 + $0x10] sm:$0xff]  ;;  %v314_v1 = vld [vmem:[%s621_s2] sm:$0xff]  ;;  %s628_s12 = smov (!%p212_p4, %s514_s12), 1  ;;  %v524_v2 = vmov 0   ;;  %vm265_vm0 = vcmask 1043456   ;;  %vm252_vm1 = vcmask 31744  }
   0xd   : > { %499 = vset.pattern.permute.xlu1 %v524_v2  ;;  %498 = vset.pattern.permute.xlu0 %v524_v2  ;;  %s458_s20 = sshll.u32 %s628_s12, 2  ;;  %v244_v4 = vld [vmem:[%s620_s1] sm:$0xff]  ;;  %v245_v5 = vld [vmem:[%s620_s1 + $0x8] sm:$0xff]  ;;  %v246_v6 = vld [vmem:[%s620_s1 + $0x10] sm:$0xff]  ;;  %vm238_vm2 = vcmask 130048   ;;  %v525_v10 = vmov 0.0  }
   0xe   : > { %330 = vperm.xlu1 %499, %v316_v0   ;;  %320 = vperm.xlu0 %498, %v314_v1   ;;  %s221_s23 = scalar_lea.vmem %s619_s0, %s458_s20  ;;  %v247_v7 = vld [vmem:[%s620_s1 + $0x18] sm:$0xff]  ;;  %v315_v9 = vld [vmem:[%s621_s2 + $0x8] sm:$0xff]  ;;  %239 = vst.msk [vmem:[#allocation2] sm:$0xff] %vm238_vm2, %v525_v10  ;;  %s468_s9 = sshll.u32 %s628_s12, 5 }
   0xf   : > { %v243_v3 = vld [vmem:[%s221_s23] sm:$0xf]  ;;  %v317_v8 = vld [vmem:[%s621_s2 + $0x18] sm:$0xff]  ;;  %240 = vst.msk [vmem:[#allocation2 + $0x8] sm:$0xff] %vm238_vm2, %v525_v10  ;;  %s233_s16 = scalar_lea.vmem %s622_s3, %s468_s9 }
  0x10   : > { %461 = vmatpush.msk.msra.mxu0 %vm265_vm0, %v243_v3  ;;  %469 = vmatpush.msk.msra.mxu1 %vm265_vm0, %v243_v3  ;;  %241 = vst.msk [vmem:[#allocation2 + $0x10] sm:$0xff] %vm238_vm2, %v525_v10 }
  0x11   : > { %470 = vmatpush.msk.msra.mxu2 %vm265_vm0, %v243_v3  ;;  %471 = vmatpush.msk.msra.mxu3 %vm265_vm0, %v243_v3  ;;  %242 = vst.msk [vmem:[#allocation2 + $0x18] sm:$0xff] %vm238_vm2, %v525_v10 }
  0x12   : > { %462 = vmatmul.msk.f32.vlgmr.msra.gmra.mxu0 %vm252_vm1, %v244_v4  ;;  %463 = vmatmul.msk.f32.vlgmr.msra.gmra.mxu1 %vm252_vm1, %v245_v5 }
  0x13   : > { %464 = vmatmul.msk.f32.vlgmr.msra.gmra.mxu2 %vm252_vm1, %v246_v6  ;;  %465 = vmatmul.msk.f32.vlgmr.msra.gmra.mxu3 %vm252_vm1, %v247_v7 }
  0x15   : > { %v248_v11 = vld [vmem:[#allocation2] sm:$0xff] }
  0x16   : > { %335 = vperm.xlu1 %499, %v317_v8   ;;  %325 = vperm.xlu0 %498, %v315_v9   ;;  %v249_v12 = vld [vmem:[#allocation2 + $0x8] sm:$0xff] }
  0x17   : > { %v250_v18 = vld [vmem:[#allocation2 + $0x10] sm:$0xff] }
  0x18   : > { %v251_v19 = vld [vmem:[#allocation2 + $0x18] sm:$0xff] }
  0x80   : > { %v321_v15 = vpop.permute.xlu0 %320  ;;  %v331_v22 = vpop.permute.xlu1 %330 }
  0x88   : > { %v326_v27 = vpop.permute.xlu0 %325  ;;  %v336_v34 = vpop.permute.xlu1 %335 }
  0x8f   : > { %v286_v13 = vpop.f32.mrf.mxu0  ;;  %v289_v14 = vpop.f32.mrf.mxu1 }
  0x90   : > { %v298_v16 = vadd.f32 %v286_v13, %v248_v11  ;;  %v299_v17 = vadd.f32 %v289_v14, %v249_v12 }
  0x92   : > { %303 = vst.msk [vmem:[#allocation2] sm:$0xff] %vm238_vm2, %v298_v16 }
  0x93   : > { %304 = vst.msk [vmem:[#allocation2 + $0x8] sm:$0xff] %vm238_vm2, %v299_v17 }
  0x96   : > { %v292_v20 = vpop.f32.mrf.mxu2  ;;  %v295_v21 = vpop.f32.mrf.mxu3 }
  0x97   : > { %v300_v23 = vadd.f32 %v292_v20, %v250_v18  ;;  %v301_v24 = vadd.f32 %v295_v21, %v251_v19 }
  0x99   : > { %v310_v25 = vld [vmem:[#allocation2] sm:$0xff]  ;;  %305 = vst.msk [vmem:[#allocation2 + $0x10] sm:$0xff] %vm238_vm2, %v300_v23 }
  0x9a   : > { %v338_v26 = vadd.f32 %v321_v15, %v310_v25  ;;  %306 = vst.msk [vmem:[#allocation2 + $0x18] sm:$0xff] %vm238_vm2, %v301_v24  ;;  %v311_v28 = vld [vmem:[#allocation2 + $0x8] sm:$0xff] }
  0x9b   : > { %v339_v29 = vadd.f32 %v326_v27, %v311_v28 }
  0x9c   : > { %v342_v30 = vmax.f32 %v338_v26, 0.0 }
  0x9d   : > { %v343_v31 = vmax.f32 %v339_v29, 0.0 }
  0x9e   : > { %346 = vst.msk [vmem:[%s233_s16] sm:$0xff] %vm238_vm2, %v342_v30 }
  0x9f   : > { %347 = vst.msk [vmem:[%s233_s16 + $0x8] sm:$0xff] %vm238_vm2, %v343_v31 }
  0xa0   : > { %v312_v32 = vld [vmem:[#allocation2 + $0x10] sm:$0xff] }
  0xa1   : > { %v340_v33 = vadd.f32 %v331_v22, %v312_v32  ;;  %v313_v35 = vld [vmem:[#allocation2 + $0x18] sm:$0xff] }
  0xa2   : > { %v341_v36 = vadd.f32 %v336_v34, %v313_v35 }
  0xa3   : > { %v344_v37 = vmax.f32 %v340_v33, 0.0 }
  0xa4   : > { %v345_v38 = vmax.f32 %v341_v36, 0.0 }
  0xa5   : > { %348 = vst.msk [vmem:[%s233_s16 + $0x10] sm:$0xff] %vm238_vm2, %v344_v37 }
  0xa6   : > { %349 = vst.msk [vmem:[%s233_s16 + $0x18] sm:$0xff] %vm238_vm2, %v345_v38 }
  0xa7 PF: > { %s13_s14 = sadd.s32 1, %s522_s14   ;;  %s623_s12 = smov %s518_s13 }
  0xa8   : > { %p10_p5 = scmp.ge.s32.totalorder %s13_s14, 4   ;;  %s624_s13 = smov %s626_s15 }
  0xaa   :  { %12 = sbr.rel (!%p10_p5) target bundleno = 2 (0x2), region = 73 }

</bundles_post_ra>
